<compile_context>
chip_gen: v6e
topology: v6e:2x2x1
jax: 0.10.0
libtpu: 0.0.40
codegen_flags: <defaults>
</compile_context>

<pallas_src>
import functools
import numpy as np
import jax
import jax.numpy as jnp
from jax import lax
from jax.experimental import pallas as pl
from jax.experimental.pallas import tpu as pltpu


def structure_map_np(samples_structure):
    """Mirror of StructureMap(): replace_rule uses sorted-unique ordering."""
    unique_structures, unique_structures_idx = np.unique(
        samples_structure, return_index=True)
    new_samples = samples_structure[np.sort(unique_structures_idx)]
    replace_rule = dict(zip(unique_structures, range(len(unique_structures))))
    smap = np.array([replace_rule[i] for i in samples_structure], dtype=np.int32)
    return smap, new_samples, replace_rule


def _round_up(v, m):
    return ((v + m - 1) // m) * m


def _chip_info():
    """Best-effort TPU generation detection: (VMEM bytes per core, TCs/device)."""
    vmem_bytes = 128 * 1024 * 1024
    cores = 1
    try:
        kind = jax.devices()[0].device_kind.lower()
    except Exception:
        kind = ""
    if ("v7" in kind) or ("7x" in kind):
        vmem_bytes = 64 * 1024 * 1024   # per-TensorCore on v7x
        cores = 2
    elif ("v4" in kind) or ("v5p" in kind):
        cores = 2                        # megacore parts
    return vmem_bytes, cores


def triplet_energy_kernel(x_ref, seg_ref, w_ref, o_ref, *, inner):
    """One (D_in, TN) sample block: folded matvec + MXU segment contraction.

    x_ref:   (D_in, TN) streamed transposed features (samples on lanes)
    seg_ref: (1, TN)    int32 structure id per sample (-1 for padding)
    w_ref:   (1, D_in)  folded weight row (w1 @ w2)^T
    o_ref:   (1, G_pad) lane-dense per-structure accumulator, resident across
                        the reduction grid axis.
    """
    k = pl.program_id(1)

    @pl.when(k == 0)
    def _init():
        o_ref[...] = jnp.zeros_like(o_ref)

    tn = x_ref.shape[1]
    g_pad = o_ref.shape[1]
    n_chunks = tn // inner

    # Tiny (G_pad, 1) iota column, built once per grid step and hoisted out of
    # the inner loop; broadcasting against the (1, inner) seg row builds the
    # one-hot without ever materializing a (TN, G_pad) iota.
    g_iota = lax.broadcasted_iota(jnp.int32, (g_pad, 1), 0)
    w_row = w_ref[...]                                     # (1, D_in)

    def body(c, acc):
        off = pl.multiple_of(c * inner, inner)
        xb = x_ref[:, pl.ds(off, inner)]                   # (D_in, inner)
        sb = seg_ref[:, pl.ds(off, inner)]                 # (1, inner) int32
        # MXU: folded matvec -> lane-dense pred row.
        pred = jnp.dot(w_row, xb, preferred_element_type=jnp.float32)  # (1, inner)
        # One-hot (G_pad, inner): compare + cast (padding rows seg=-1 match none).
        h = (sb == g_iota).astype(jnp.float32)
        # MXU: segment reduction -- contract the lane (sample) axis of both.
        part = lax.dot_general(pred, h, (((1,), (1,)), ((), ())),
                               preferred_element_type=jnp.float32)     # (1, G_pad)
        return acc + part

    acc = lax.fori_loop(0, n_chunks, body,
                        jnp.zeros((1, g_pad), jnp.float32),
                        unroll=n_chunks <= 4)
    o_ref[...] += acc


def triplet_energy_forward(x, w1, b1, w2, b2, smap, num_structures,
                           *, rows_per_block=None, stream_dtype=jnp.float32):
    """x: (N, D_in); w1: (D_in, H); b1: (1, H); w2: (H, 1); b2: (1, 1);
    smap: (N,) int32 structure index per sample; num_structures: G.
    Returns (G, 1) f32 per-structure energies (matches torch index_add_)."""
    N, D_in = x.shape
    G = int(num_structures)

    # --- fold the two Linear layers (no nonlinearity between them) ----------
    w1f = w1.astype(jnp.float32)
    w2f = w2.astype(jnp.float32)
    w_eff_t = (w1f @ w2f).reshape(1, D_in)                  # (1, D_in)
    b_eff = (b1.astype(jnp.float32) @ w2f
             + b2.astype(jnp.float32)).reshape(())          # scalar

    smap_i = jnp.asarray(smap, dtype=jnp.int32)
    # Bias folded out of the kernel: each structure gets count_g * b_eff.
    counts = jnp.bincount(smap_i, length=G).astype(jnp.float32).reshape(G, 1)

    # --- chip-gated tiling ---------------------------------------------------
    LANE = 128
    CHUNK = 512
    vmem_bytes, cores = _chip_info()
    elt = jnp.dtype(stream_dtype).itemsize
    per_buf_cap = vmem_bytes // 8            # x tile budget (double-buffered)

    if rows_per_block is None:
        tn = min(4 * 1024 * 1024, per_buf_cap) // (D_in * elt)
    else:
        tn = int(rows_per_block)
    tn = max(LANE, min(tn, per_buf_cap // (D_in * elt), _round_up(N, LANE)))
    if tn >= CHUNK:
        tn = _round_up(tn, CHUNK)
        inner = CHUNK
    else:
        tn = _round_up(tn, LANE)
        inner = tn

    G_pad = _round_up(max(G, 1), LANE)
    # TODO(synk): very large G needs blocking over the structure axis; as a
    # stopgap shrink the inner chunk so the (G_pad, inner) one-hot stays small.
    if G_pad * inner * 4 > (4 << 20):
        inner = LANE

    num_blocks = pl.cdiv(N, tn)
    P = cores if (cores > 1 and num_blocks >= cores) else 1
    K = pl.cdiv(num_blocks, P)
    N_pad = P * K * tn

    # --- lane-dense, transposed streaming layout -----------------------------
    x_t = jnp.pad(x.astype(jnp.float32).T, ((0, 0), (0, N_pad - N)))
    x_t = x_t.astype(stream_dtype)                           # (D_in, N_pad)
    w_t = w_eff_t.astype(stream_dtype)                       # (1, D_in)
    seg = jnp.pad(smap_i.reshape(1, N), ((0, 0), (0, N_pad - N)),
                  constant_values=-1)                        # (1, N_pad)

    kernel = functools.partial(triplet_energy_kernel, inner=inner)

    out = pl.pallas_call(
        kernel,
        out_shape=jax.ShapeDtypeStruct((1, P * G_pad), jnp.float32),
        grid=(P, K),
        in_specs=[
            pl.BlockSpec((D_in, tn), lambda p, k: (0, p * K + k)),  # x (transposed)
            pl.BlockSpec((1, tn), lambda p, k: (0, p * K + k)),     # structure ids
            pl.BlockSpec((1, D_in), lambda p, k: (0, 0)),           # folded weight row
        ],
        out_specs=pl.BlockSpec((1, G_pad), lambda p, k: (0, p)),
        compiler_params=pltpu.CompilerParams(
            dimension_semantics=("parallel", "arbitrary"),
            vmem_limit_bytes=int(vmem_bytes * 3 // 4)),
    )(x_t, seg, w_t)

    # Combine the P partial accumulators, drop lane padding, add folded bias.
    out = jnp.sum(out.reshape(P, G_pad), axis=0)[:G].reshape(G, 1)
    return out + counts * b_eff


if __name__ == "__main__":
    # ---- Test 1: tiny shapes consistent with the module ---------------------
    N = 8
    input_size = 32
    intermediate_size = hidden_size = 16

    key = jax.random.PRNGKey(0)
    kx, k1, kb1, k2, kb2 = jax.random.split(key, 5)

    x = jax.random.normal(kx, (N, input_size), dtype=jnp.float32)
    lim1 = 1.0 / np.sqrt(input_size)
    w1 = jax.random.uniform(k1, (input_size, intermediate_size),
                            minval=-lim1, maxval=lim1, dtype=jnp.float32)
    b1 = jax.random.uniform(kb1, (1, intermediate_size),
                            minval=-lim1, maxval=lim1, dtype=jnp.float32)
    lim2 = 1.0 / np.sqrt(hidden_size)
    w2 = jax.random.uniform(k2, (hidden_size, 1),
                            minval=-lim2, maxval=lim2, dtype=jnp.float32)
    b2 = jax.random.uniform(kb2, (1, 1),
                            minval=-lim2, maxval=lim2, dtype=jnp.float32)

    samples = {"structure": np.array(
        ["mol_b", "mol_a", "mol_c", "mol_a", "mol_b", "mol_c", "mol_a", "mol_b"])}
    smap, new_samples, _ = structure_map_np(samples["structure"])
    G = len(new_samples)

    out = triplet_energy_forward(x, w1, b1, w2, b2, jnp.asarray(smap), G)
    out = jax.block_until_ready(out)

    pred_ref = np.asarray(x) @ np.asarray(w1) + np.asarray(b1)
    pred_ref = pred_ref @ np.asarray(w2) + np.asarray(b2)        # (N, 1)
    ref = np.zeros((G, 1), dtype=np.float32)
    np.add.at(ref, smap, pred_ref)                               # index_add_
    np.testing.assert_allclose(np.asarray(out), ref, rtol=1e-5, atol=1e-5)

    # ---- Test 2: larger N exercising tiling, padding, chunking, parallel axis
    N2, D2, G2 = 1000, 32, 5
    k3, k4, k5 = jax.random.split(jax.random.PRNGKey(1), 3)
    x2 = jax.random.normal(k3, (N2, D2), dtype=jnp.float32)
    w1b = jax.random.uniform(k4, (D2, hidden_size),
                             minval=-lim1, maxval=lim1, dtype=jnp.float32)
    smap2 = np.asarray(jax.random.randint(k5, (N2,), 0, G2, dtype=jnp.int32))

    pred2 = np.asarray(x2) @ np.asarray(w1b) + np.asarray(b1)
    pred2 = pred2 @ np.asarray(w2) + np.asarray(b2)
    ref2 = np.zeros((G2, 1), dtype=np.float32)
    np.add.at(ref2, smap2, pred2)

    # (a) default tiling: one big row block, in-kernel 512-sample chunks
    out2a = jax.block_until_ready(
        triplet_energy_forward(x2, w1b, b1, w2, b2, jnp.asarray(smap2), G2))
    np.testing.assert_allclose(np.asarray(out2a), ref2, rtol=1e-4, atol=1e-4)

    # (b) small row blocks: multi-step reduction grid (and P split on 2-TC parts)
    out2b = jax.block_until_ready(
        triplet_energy_forward(x2, w1b, b1, w2, b2, jnp.asarray(smap2), G2,
                               rows_per_block=256))
    np.testing.assert_allclose(np.asarray(out2b), ref2, rtol=1e-4, atol=1e-4)

    print("KERNEL_OK")
</pallas_src>

<mosaic_0001>
module attributes {stable_mosaic.version = 11 : i64} {
  func.func @triplet_energy_kernel(%arg0: i32, %arg1: i32, %arg2: memref<32x128xf32, #tpu.memory_space<vmem>>, %arg3: memref<1x128xi32, #tpu.memory_space<vmem>>, %arg4: memref<1x32xf32, #tpu.memory_space<vmem>>, %arg5: memref<1x128xf32, #tpu.memory_space<vmem>>) attributes {dimension_semantics = [#tpu.dimension_semantics<parallel>, #tpu.dimension_semantics<arbitrary>], iteration_bounds = array<i64: 1, 1>, scalar_prefetch = 0 : i64, scratch_operands = 0 : i64, tpu.core_type = #tpu.core_type<tc>, window_params = [{transform_indices = @transform_0, window_bounds = array<i64: 32, 128>}, {transform_indices = @transform_1, window_bounds = array<i64: 1, 128>}, {pipeline_mode = #tpu.pipeline_mode<synchronous>, transform_indices = @transform_2, window_bounds = array<i64: 1, 32>}, {transform_indices = @transform_3, window_bounds = array<i64: 1, 128>}]} {
    %c0_i32 = arith.constant 0 : i32
    %0 = arith.cmpi eq, %arg1, %c0_i32 : i32
    %1 = arith.extui %0 : i1 to i32
    %c0_i32_0 = arith.constant 0 : i32
    %2 = arith.cmpi ne, %1, %c0_i32_0 : i32
    scf.if %2 {
      %cst_11 = arith.constant 0.000000e+00 : f32
      %23 = vector.broadcast %cst_11 : f32 to vector<1x128xf32>
      %c0_12 = arith.constant 0 : index
      %c0_13 = arith.constant 0 : index
      %24 = vector.load %arg5[%c0_12, %c0_13] : memref<1x128xf32, #tpu.memory_space<vmem>>, vector<1x128xf32>
      tpu.vector_store %arg5[%c0_12, %c0_13], %23 {strides = array<i32>} : memref<1x128xf32, #tpu.memory_space<vmem>>, vector<1x128xf32>,
    } else {
    }
    %3 = tpu.iota {dimensions = array<i32: 0>} : vector<128x1xi32>
    %c0 = arith.constant 0 : index
    %c0_1 = arith.constant 0 : index
    %4 = vector.load %arg4[%c0, %c0_1] : memref<1x32xf32, #tpu.memory_space<vmem>>, vector<1x32xf32>
    %cst = arith.constant 0.000000e+00 : f32
    %5 = vector.broadcast %cst : f32 to vector<1x128xf32>
    %c0_i32_2 = arith.constant 0 : i32
    %c128_i32 = arith.constant 128 : i32
    %6 = arith.muli %c0_i32_2, %c128_i32 : i32
    %7 = tpu.assume_multiple %6, 128 : i32
    %c0_3 = arith.constant 0 : index
    %8 = arith.index_cast %7 : i32 to index
    %9 = vector.load %arg2[%c0_3, %8] : memref<32x128xf32, #tpu.memory_space<vmem>>, vector<32x128xf32>
    %c0_4 = arith.constant 0 : index
    %10 = arith.index_cast %7 : i32 to index
    %11 = vector.load %arg3[%c0_4, %10] : memref<1x128xi32, #tpu.memory_space<vmem>>, vector<1x128xi32>
    %cst_5 = arith.constant dense<0.000000e+00> : vector<1x128xf32>
    %12 = tpu.matmul %4, %9, %cst_5 {dimension_numbers = #tpu.dot_dimension_numbers<[1], [0], [0], [1], [0, 0, 1, 1], [], []>} : vector<1x32xf32>, vector<32x128xf32>, vector<1x128xf32> -> vector<1x128xf32>
    %13 = vector.broadcast %11 : vector<1x128xi32> to vector<128x128xi32>
    %14 = vector.broadcast %3 : vector<128x1xi32> to vector<128x128xi32>
    %15 = arith.cmpi eq, %13, %14 : vector<128x128xi32>
    %16 = arith.extui %15 : vector<128x128xi1> to vector<128x128xi32>
    %17 = arith.sitofp %16 : vector<128x128xi32> to vector<128x128xf32>
    %cst_6 = arith.constant dense<0.000000e+00> : vector<1x128xf32>
    %18 = tpu.matmul %12, %17, %cst_6 {dimension_numbers = #tpu.dot_dimension_numbers<[1], [1], [0], [0], [0, 0, 1, 0], [], []>} : vector<1x128xf32>, vector<128x128xf32>, vector<1x128xf32> -> vector<1x128xf32>
    %19 = arith.addf %5, %18 : vector<1x128xf32>
    %c1_i32 = arith.constant 1 : i32
    %c0_7 = arith.constant 0 : index
    %c0_8 = arith.constant 0 : index
    %20 = vector.load %arg5[%c0_7, %c0_8] : memref<1x128xf32, #tpu.memory_space<vmem>>, vector<1x128xf32>
    %21 = arith.addf %20, %19 : vector<1x128xf32>
    %c0_9 = arith.constant 0 : index
    %c0_10 = arith.constant 0 : index
    %22 = vector.load %arg5[%c0_9, %c0_10] : memref<1x128xf32, #tpu.memory_space<vmem>>, vector<1x128xf32>
    tpu.vector_store %arg5[%c0_9, %c0_10], %21 {strides = array<i32>} : memref<1x128xf32, #tpu.memory_space<vmem>>, vector<1x128xf32>,
    return
  }
  func.func @transform_0(%arg0: i32, %arg1: i32) -> (i32, i32) {
    %c1_i32 = arith.constant 1 : i32
    %0 = arith.muli %arg0, %c1_i32 : i32
    %1 = arith.addi %0, %arg1 : i32
    %c0_i32 = arith.constant 0 : i32
    %c0_i32_0 = arith.constant 0 : i32
    return %c0_i32, %1 : i32, i32
  }
  func.func @transform_1(%arg0: i32, %arg1: i32) -> (i32, i32) {
    %c1_i32 = arith.constant 1 : i32
    %0 = arith.muli %arg0, %c1_i32 : i32
    %1 = arith.addi %0, %arg1 : i32
    %c0_i32 = arith.constant 0 : i32
    %c0_i32_0 = arith.constant 0 : i32
    return %c0_i32, %1 : i32, i32
  }
  func.func @transform_2(%arg0: i32, %arg1: i32) -> (i32, i32) {
    %c0_i32 = arith.constant 0 : i32
    %c0_i32_0 = arith.constant 0 : i32
    %c0_i32_1 = arith.constant 0 : i32
    return %c0_i32, %c0_i32_0 : i32, i32
  }
  func.func @transform_3(%arg0: i32, %arg1: i32) -> (i32, i32) {
    %c0_i32 = arith.constant 0 : i32
    %c0_i32_0 = arith.constant 0 : i32
    return %c0_i32, %arg0 : i32, i32
  }
}

</mosaic_0001>

<bundles_post_ra>
// kernel: tpu_custom_call.1
= control target key start
LH: loop header
LB: loop body
LE: loop exit
PB: predicated region body
PF: predicated region fallthrough
CT: control target
= control target key end

     0   :  { %8 = vsyncpa [#allocation3], 0  ;;  %s559_s0 = inlined_call_operand.hbm [shape: f32[32,128], index: 0, kind: input, shape index: {}]   ;;  %s560_s1 = inlined_call_operand.vmem [shape: s32[1,128], index: 1, kind: input, shape index: {}]   ;;  %s561_s2 = inlined_call_operand.vmem [shape: f32[1,32], index: 2, kind: input, shape index: {}]   ;;  %s562_s3 = inlined_call_operand.hbm [shape: f32[1,128], index: 3, kind: output, shape index: {}]  }
   0x1   :  { %9 = vsyncpa [#allocation4], 0  ;;  %s445_s12 = smov [#allocation2]  }
   0x2   :  { %s18_s13 = sshll.u32 %s445_s12, 4  ;;  %s19_s13 = int_to_ptr.vmem [resolvable:$true] %s18_s13 }
   0x3   :  { %s409_s14 = scalar_lea.vmem %s19_s13, 512  ;;  %p414_p1 = scmp.lt.s32.totalorder %s19_s13, %s19_s13 }
   0x4   :  { %p410_p0 = scmp.ne.s32.totalorder %s19_s13, %s409_s14  ;;  %p415_p2 = scmp.lt.s32.totalorder %s409_s14, %s409_s14 }
   0x6   :  { %p416_p3 = por %p415_p2, %p414_p1 }
   0x8   :  { %p417_p4 = pnand %p416_p3, %p410_p0 }
   0xa   :  { %420 = shalt.err (!%p417_p4)
}
   0xb   :  { %s446_s15 = smov 128   ;;  %s447_s16 = smov 8  }
   0xc   :  { %24 = dma.hbm_to_vmem [thread:$0]  %s559_s0, 512, %s19_s13, [#allocation3], %s446_s15, %s446_s15, %s447_s16  }
   0xd   :  { %441 = dma.done.wait [#allocation3], 512  }
   0xe   :  { %442 = vsyncadd [#allocation3], 4294966784  ;;  %v52_v0 = vlaneseq  ;;  %v448_v1 = vmov 0.0   ;;  %vm449_vm0 = vmmov 0   ;;  %v73_v4 = vld [vmem:[#allocation2 + $0x18] sm:$0xff]  ;;  %v72_v5 = vld [vmem:[#allocation2 + $0x10] sm:$0xff] }
   0xf   :  { %51 = vst [vmem:[#allocation5] sm:$0x1] %v448_v1  ;;  %348 = vmatprep.subr.mxu0 %v448_v1  ;;  %356 = vmatprep.mubr.msk.f32.mxu0 %vm449_vm0, %v448_v1  ;;  %v487_v7 = vld [vmem:[%s560_s1] ss:$0 sm:$0xff]  ;;  %v71_v8 = vld [vmem:[#allocation2 + $0x8] sm:$0xff]  ;;  %v450_v9 = vmov 1.0  }
  0x10   :  { %359 = vmatprep.subr.mxu1 %v448_v1  ;;  %v479_v2 = vshrl.u32 %v52_v0, 7  ;;  %391 = vmatprep.mubr.msk.f32.mxu1 %vm449_vm0, %v448_v1  ;;  %v70_v10 = vld [vmem:[#allocation2] sm:$0xff]  ;;  %vm75_vm3 = vcmask 261120  }
  0x11   :  { %349 = vmatpush3.msra.mxu0 %v73_v4  ;;  %v69_v12 = vld [vmem:[%s561_s2] sm:$0x1]  ;;  %s451_s2 = smov [#allocation5]  }
  0x12   :  { %v68_v3 = vadd.s32 120, %v479_v2  ;;  %v67_v6 = vadd.s32 112, %v479_v2  ;;  %350 = vmatprep.subr.mxu0 %v448_v1  ;;  %v66_v11 = vadd.s32 104, %v479_v2  ;;  %v65_v13 = vadd.s32 96, %v479_v2  ;;  %s280_s21 = sshll.u32 %s451_s2, 4  ;;  %s281_s21 = int_to_ptr.vmem [resolvable:$true] %s280_s21 }
  0x13   :  { %351 = vmatpush3.msra.mxu0 %v72_v5  ;;  %v64_v14 = vadd.s32 88, %v479_v2  ;;  %v63_v15 = vadd.s32 80, %v479_v2  ;;  %v62_v16 = vadd.s32 72, %v479_v2  ;;  %v61_v17 = vadd.s32 64, %v479_v2  ;;  %s421_s22 = scalar_lea.vmem %s281_s21, 16  ;;  %s425_s23 = scalar_lea.vmem %s281_s21, 32 }
  0x14   :  { %vm168_vm1 = vcmp.eq.s32.totalorder %v487_v7, %v68_v3  ;;  %352 = vmatprep.subr.mxu0 %v448_v1  ;;  %vm167_vm2 = vcmp.eq.s32.totalorder %v487_v7, %v67_v6  ;;  %vm166_vm4 = vcmp.eq.s32.totalorder %v487_v7, %v66_v11  ;;  %vm165_vm5 = vcmp.eq.s32.totalorder %v487_v7, %v65_v13  ;;  %p422_p5 = scmp.ne.s32.totalorder %s281_s21, %s421_s22  ;;  %p426_p6 = scmp.lt.s32.totalorder %s281_s21, %s281_s21 }
  0x15   :  { %360 = vmatpush3.xpose.msk.msra.mxu1 %vm168_vm1, %v450_v9  ;;  %353 = vmatpush3.msra.mxu0 %v71_v8  ;;  %vm164_vm6 = vcmp.eq.s32.totalorder %v487_v7, %v64_v14  ;;  %vm163_vm7 = vcmp.eq.s32.totalorder %v487_v7, %v63_v15  ;;  %vm162_vm8 = vcmp.eq.s32.totalorder %v487_v7, %v62_v16  ;;  %v60_v18 = vadd.s32 56, %v479_v2  ;;  %p427_p7 = scmp.lt.s32.totalorder %s425_s23, %s421_s22 }
  0x16   :  { %361 = vmatprep.subr.mxu1 %v448_v1  ;;  %354 = vmatprep.subr.mxu0 %v448_v1  ;;  %vm161_vm9 = vcmp.eq.s32.totalorder %v487_v7, %v61_v17  ;;  %v59_v19 = vadd.s32 48, %v479_v2  ;;  %v58_v20 = vadd.s32 40, %v479_v2  ;;  %v57_v21 = vadd.s32 32, %v479_v2  ;;  %v271_v27 = vld [vmem:[#allocation5] sm:$0x1] }
  0x17   :  { %355 = vmatpush3.msra.mxu0 %v70_v10  ;;  %vm160_vm10 = vcmp.eq.s32.totalorder %v487_v7, %v60_v18  ;;  %v56_v22 = vadd.s32 24, %v479_v2  ;;  %v55_v23 = vadd.s32 16, %v479_v2  ;;  %v54_v24 = vadd.s32 8, %v479_v2  ;;  %p428_p8 = por %p427_p7, %p426_p6 }
  0x18   :  { %357 = vmatmul.mubr.msk.f32.vlgmr.msra.gmra.mxu0 %vm75_vm3, %v69_v12  ;;  %vm159_vm11 = vcmp.eq.s32.totalorder %v487_v7, %v59_v19  ;;  %vm158_vm12 = vcmp.eq.s32.totalorder %v487_v7, %v58_v20  ;;  %vm157_vm13 = vcmp.eq.s32.totalorder %v487_v7, %v57_v21  ;;  %vm153_vm1 = vcmp.eq.s32.totalorder %v487_v7, %v479_v2 }
  0x19   :  { %362 = vmatpush3.xpose.msk.msra.mxu1 %vm167_vm2, %v450_v9  ;;  %vm156_vm14 = vcmp.eq.s32.totalorder %v487_v7, %v56_v22  ;;  %vm155_vm15 = vcmp.eq.s32.totalorder %v487_v7, %v55_v23  ;;  %vm154_vm0 = vcmp.eq.s32.totalorder %v487_v7, %v54_v24  ;;  %p429_p9 = pnand %p428_p8, %p422_p5 }
  0x1a   :  { %363 = vmatprep.subr.mxu1 %v448_v1 }
  0x1d   :  { %364 = vmatpush3.xpose.msk.msra.mxu1 %vm166_vm4, %v450_v9 }
  0x1e   :  { %365 = vmatprep.subr.mxu1 %v448_v1 }
  0x21   :  { %366 = vmatpush3.xpose.msk.msra.mxu1 %vm165_vm5, %v450_v9 }
  0x22   :  { %367 = vmatprep.subr.mxu1 %v448_v1 }
  0x25   :  { %368 = vmatpush3.xpose.msk.msra.mxu1 %vm164_vm6, %v450_v9 }
  0x26   :  { %369 = vmatprep.subr.mxu1 %v448_v1 }
  0x29   :  { %370 = vmatpush3.xpose.msk.msra.mxu1 %vm163_vm7, %v450_v9 }
  0x2a   :  { %371 = vmatprep.subr.mxu1 %v448_v1 }
  0x2d   :  { %372 = vmatpush3.xpose.msk.msra.mxu1 %vm162_vm8, %v450_v9 }
  0x2e   :  { %373 = vmatprep.subr.mxu1 %v448_v1 }
  0x31   :  { %374 = vmatpush3.xpose.msk.msra.mxu1 %vm161_vm9, %v450_v9 }
  0x32   :  { %375 = vmatprep.subr.mxu1 %v448_v1 }
  0x35   :  { %376 = vmatpush3.xpose.msk.msra.mxu1 %vm160_vm10, %v450_v9 }
  0x36   :  { %377 = vmatprep.subr.mxu1 %v448_v1 }
  0x39   :  { %378 = vmatpush3.xpose.msk.msra.mxu1 %vm159_vm11, %v450_v9 }
  0x3a   :  { %379 = vmatprep.subr.mxu1 %v448_v1 }
  0x3d   :  { %380 = vmatpush3.xpose.msk.msra.mxu1 %vm158_vm12, %v450_v9 }
  0x3e   :  { %381 = vmatprep.subr.mxu1 %v448_v1 }
  0x41   :  { %382 = vmatpush3.xpose.msk.msra.mxu1 %vm157_vm13, %v450_v9 }
  0x42   :  { %383 = vmatprep.subr.mxu1 %v448_v1 }
  0x45   :  { %384 = vmatpush3.xpose.msk.msra.mxu1 %vm156_vm14, %v450_v9 }
  0x46   :  { %385 = vmatprep.subr.mxu1 %v448_v1 }
  0x49   :  { %386 = vmatpush3.xpose.msk.msra.mxu1 %vm155_vm15, %v450_v9 }
  0x4a   :  { %387 = vmatprep.subr.mxu1 %v448_v1 }
  0x4d   :  { %388 = vmatpush3.xpose.msk.msra.mxu1 %vm154_vm0, %v450_v9 }
  0x4e   :  { %389 = vmatprep.subr.mxu1 %v448_v1 }
  0x51   :  { %390 = vmatpush3.xpose.msk.msra.mxu1 %vm153_vm1, %v450_v9 }
  0xd8   :  { %v145_v25 = vpop.f32.mrf.mxu0 }
  0xd9   :  { %392 = vmatmul.mubr.f32.vlgmr.msra.gmra.mxu1 %v145_v25 }
  0xda   :  { %v358_v26 = vpop.f32.mrf.mxu0 }
 0x199   :  { %v267_v28 = vpop.f32.mrf.mxu1 }
 0x19a   :  { %v272_v29 = vadd.f32 %v271_v27, %v267_v28 }
 0x19b   :  { %v393_v30 = vpop.f32.mrf.mxu1 }
 0x19c   :  { %273 = vst [vmem:[#allocation5] sm:$0x1] %v272_v29 }
 0x19d   :  { %432 = shalt.err (!%p429_p9)
}
 0x19e   :  { %283 = dma.vmem_to_hbm [thread:$0]  %s281_s21, 16, %s562_s3, [#allocation4]  }
 0x19f   :  { %443 = dma.done.wait [#allocation4], 16  }
 0x1a0   :  { %444 = vsyncadd [#allocation4], 4294967280 }
 0x1a1   :  { %287 = vsyncpa [#allocation3], 1 }
 0x1a2   :  { %288 = vsyncpa [#allocation4], 1 }

</bundles_post_ra>
